<compile_context>
chip_gen: v5e
topology: v5e:2x2
jax: 0.10.0
libtpu: 0.0.40
codegen_flags: <defaults>
</compile_context>

<pallas_src>
import jax
import jax.numpy as jnp
from jax import lax
from jax.experimental import pallas as pl
from jax.experimental.pallas import tpu as pltpu

SUBLANE = 8
LANE = 128


def _round_up(x, m):
    return ((x + m - 1) // m) * m


def _dqn_kernel(xT_ref, w1T_ref, b1T_ref, w2T_ref, b2T_ref, w3T_ref, b3T_ref, oT_ref):
    # Feature-major: features on sublanes, batch on lanes.
    # Layer 1 (MXU, f32, K = obs padded to 8): [128, 8] @ [8, Bt] -> [128, Bt].
    h1 = jnp.dot(w1T_ref[...], xT_ref[...], preferred_element_type=jnp.float32)
    h1 = jnp.maximum(h1 + b1T_ref[...], 0.0)

    # Layer 2 (MXU, bf16 x bf16 -> f32 acc): [128, 128] @ [128, Bt] -> [128, Bt].
    h2 = jnp.dot(w2T_ref[...], h1.astype(jnp.bfloat16),
                 preferred_element_type=jnp.float32)
    h2 = jnp.maximum(h2 + b2T_ref[...], 0.0)

    # Layer 3 (MXU, n_actions sublane-padded to 8): [8, 128] @ [128, Bt] -> [8, Bt].
    out = jnp.dot(w3T_ref[...], h2.astype(jnp.bfloat16),
                  preferred_element_type=jnp.float32)
    oT_ref[...] = (out + b3T_ref[...]).astype(oT_ref.dtype)


def _pick_batch_tile(B, cap):
    """Batch tile in lanes: multiple of 128, one tile for small batches,
    >= 2 tiles for mid/large batches (v7x megacore), capped at `cap`."""
    b128 = _round_up(max(B, 1), LANE)
    if b128 <= 2 * LANE:
        return b128
    return min(cap, _round_up(b128 // 2, LANE))


def dqn_forward(x, params, *, batch_tile=512):
    """x: [B, n_obs] float32.  Returns [B, n_actions] float32 Q-values."""
    w1T, b1T = params["w1T"], params["b1T"]
    w2T, b2T = params["w2T"], params["b2T"]
    w3T, b3T = params["w3T"], params["b3T"]
    n_actions = params["n_actions"]

    B, n_obs = x.shape
    obs_pad = w1T.shape[1]   # 8
    act_pad = w3T.shape[0]   # 8

    bt = _pick_batch_tile(B, batch_tile)
    b_pad = _round_up(B, bt)

    # Single wrapper pad + transpose to feature-major: [B, n_obs] -> [obs_pad, b_pad].
    # (Tiny: <= a few KB on the per-step path; padded lanes never reach the output.)
    xT = jnp.pad(x, ((0, b_pad - B), (0, obs_pad - n_obs))).T

    grid = (b_pad // bt,)

    def resident(shape):
        # Block index never changes across the grid -> DMA'd once, stays VMEM-resident.
        return pl.BlockSpec(shape, lambda b: (0, 0))

    outT = pl.pallas_call(
        _dqn_kernel,
        out_shape=jax.ShapeDtypeStruct((act_pad, b_pad), jnp.float32),
        grid=grid,
        in_specs=[
            pl.BlockSpec((obs_pad, bt), lambda b: (0, b)),   # x_T tiled over batch lanes
            resident(w1T.shape), resident(b1T.shape),
            resident(w2T.shape), resident(b2T.shape),
            resident(w3T.shape), resident(b3T.shape),
        ],
        out_specs=pl.BlockSpec((act_pad, bt), lambda b: (0, b)),
        compiler_params=pltpu.CompilerParams(
            dimension_semantics=("parallel",),               # batch tiles -> both v7x TCs
        ),
    )(xT, w1T, b1T, w2T, b2T, w3T, b3T)

    # TODO(synk): for the per-env-step path (B=1..8) the remaining cost is kernel launch
    # plus the ~70 KB weight DMA re-fetched every call; a cross-pallas_call weight-prefetch
    # future (P10: pl.ANY prologue + SEMAPHORE/VMEM outputs) or batching several env steps
    # into one call would remove it.
    return outT[:n_actions, :B].T


def init_dqn_params(key, n_observations, n_actions, hidden=128):
    """torch nn.Linear default init U(-1/sqrt(fan_in), +1/sqrt(fan_in)).  Weights are
    kept in torch's [out_features, in_features] layout, which is exactly the
    feature-major orientation (W @ x_T + b) the kernel consumes — no transposes."""
    keys = jax.random.split(key, 6)

    def linear(kw, kb, fan_in, fan_out):
        bound = 1.0 / (fan_in ** 0.5)
        w = jax.random.uniform(kw, (fan_out, fan_in), jnp.float32, -bound, bound)
        b = jax.random.uniform(kb, (fan_out,), jnp.float32, -bound, bound)
        return w, b

    w1, b1 = linear(keys[0], keys[1], n_observations, hidden)
    w2, b2 = linear(keys[2], keys[3], hidden, hidden)
    w3, b3 = linear(keys[4], keys[5], hidden, n_actions)

    obs_pad = _round_up(n_observations, SUBLANE)   # 4 -> 8 (MXU contraction pad)
    act_pad = _round_up(n_actions, SUBLANE)        # 2 -> 8 (sublane pad, not 128 lanes)

    w1T = jnp.zeros((hidden, obs_pad), jnp.float32).at[:, :n_observations].set(w1)
    b1T = b1.reshape(hidden, 1)
    w2T = w2.astype(jnp.bfloat16)
    b2T = b2.reshape(hidden, 1)
    w3T = jnp.zeros((act_pad, hidden), jnp.float32).at[:n_actions, :].set(w3)
    w3T = w3T.astype(jnp.bfloat16)
    b3T = jnp.zeros((act_pad, 1), jnp.float32).at[:n_actions, 0].set(b3)

    return {"w1T": w1T, "b1T": b1T, "w2T": w2T, "b2T": b2T, "w3T": w3T, "b3T": b3T,
            "n_obs": n_observations, "n_actions": n_actions}


def dqn_reference(x, params):
    """Pure-JAX mirror of the kernel's numerics (f32 layer 1; bf16 weights and
    bf16-cast activations with f32 accumulation for layers 2/3)."""
    n_obs = x.shape[1]
    obs_pad = params["w1T"].shape[1]
    xT = jnp.pad(x, ((0, 0), (0, obs_pad - n_obs))).T
    h1 = jnp.dot(params["w1T"], xT, precision=lax.Precision.HIGHEST) + params["b1T"]
    h1 = jnp.maximum(h1, 0.0)
    h2 = jnp.dot(params["w2T"], h1.astype(jnp.bfloat16),
                 preferred_element_type=jnp.float32) + params["b2T"]
    h2 = jnp.maximum(h2, 0.0)
    out = jnp.dot(params["w3T"], h2.astype(jnp.bfloat16),
                  preferred_element_type=jnp.float32) + params["b3T"]
    return out[:params["n_actions"], :].T


if __name__ == "__main__":
    # CartPole: 4 observations, 2 actions.
    n_observations = 4
    n_actions = 2

    key = jax.random.PRNGKey(0)
    k_params, k_x = jax.random.split(key)
    params = init_dqn_params(k_params, n_observations, n_actions, hidden=128)

    # Small per-env-step inference batch.
    x = jax.random.normal(k_x, (8, n_observations), dtype=jnp.float32)
    out = jax.block_until_ready(dqn_forward(x, params))
    ref = dqn_reference(x, params)
    assert out.shape == (8, n_actions)
    assert jnp.allclose(out, ref, atol=1e-3, rtol=1e-3), "mismatch vs reference (B=8)"

    # Replay-buffer-sized batch exercising multiple batch tiles + pad/slice.
    x_big = jax.random.normal(jax.random.PRNGKey(1), (300, n_observations),
                              dtype=jnp.float32)
    out_big = jax.block_until_ready(dqn_forward(x_big, params))
    ref_big = dqn_reference(x_big, params)
    assert out_big.shape == (300, n_actions)
    assert jnp.allclose(out_big, ref_big, atol=1e-3, rtol=1e-3), "mismatch vs reference (B=300)"

    print("KERNEL_OK")
</pallas_src>

<mosaic_0001>
module attributes {stable_mosaic.version = 11 : i64} {
  func.func @_dqn_kernel(%arg0: i32, %arg1: memref<8x128xf32, #tpu.memory_space<vmem>>, %arg2: memref<128x8xf32, #tpu.memory_space<vmem>>, %arg3: memref<128x1xf32, #tpu.memory_space<vmem>>, %arg4: memref<128x128xbf16, #tpu.memory_space<vmem>>, %arg5: memref<128x1xf32, #tpu.memory_space<vmem>>, %arg6: memref<8x128xbf16, #tpu.memory_space<vmem>>, %arg7: memref<8x1xf32, #tpu.memory_space<vmem>>, %arg8: memref<8x128xf32, #tpu.memory_space<vmem>>) attributes {dimension_semantics = [#tpu.dimension_semantics<parallel>], iteration_bounds = array<i64: 1>, scalar_prefetch = 0 : i64, scratch_operands = 0 : i64, tpu.core_type = #tpu.core_type<tc>, window_params = [{transform_indices = @transform_0, window_bounds = array<i64: 8, 128>}, {pipeline_mode = #tpu.pipeline_mode<synchronous>, transform_indices = @transform_1, window_bounds = array<i64: 128, 8>}, {pipeline_mode = #tpu.pipeline_mode<synchronous>, transform_indices = @transform_2, window_bounds = array<i64: 128, 1>}, {pipeline_mode = #tpu.pipeline_mode<synchronous>, transform_indices = @transform_3, window_bounds = array<i64: 128, 128>}, {pipeline_mode = #tpu.pipeline_mode<synchronous>, transform_indices = @transform_4, window_bounds = array<i64: 128, 1>}, {pipeline_mode = #tpu.pipeline_mode<synchronous>, transform_indices = @transform_5, window_bounds = array<i64: 8, 128>}, {pipeline_mode = #tpu.pipeline_mode<synchronous>, transform_indices = @transform_6, window_bounds = array<i64: 8, 1>}, {transform_indices = @transform_7, window_bounds = array<i64: 8, 128>}]} {
    %c0 = arith.constant 0 : index
    %c0_0 = arith.constant 0 : index
    %0 = vector.load %arg2[%c0, %c0_0] : memref<128x8xf32, #tpu.memory_space<vmem>>, vector<128x8xf32>
    %c0_1 = arith.constant 0 : index
    %c0_2 = arith.constant 0 : index
    %1 = vector.load %arg1[%c0_1, %c0_2] : memref<8x128xf32, #tpu.memory_space<vmem>>, vector<8x128xf32>
    %cst = arith.constant dense<0.000000e+00> : vector<128x128xf32>
    %2 = tpu.matmul %0, %1, %cst {dimension_numbers = #tpu.dot_dimension_numbers<[1], [0], [0], [1], [0, 0, 1, 1], [], []>} : vector<128x8xf32>, vector<8x128xf32>, vector<128x128xf32> -> vector<128x128xf32>
    %c0_3 = arith.constant 0 : index
    %c0_4 = arith.constant 0 : index
    %3 = vector.load %arg3[%c0_3, %c0_4] : memref<128x1xf32, #tpu.memory_space<vmem>>, vector<128x1xf32>
    %4 = vector.broadcast %3 : vector<128x1xf32> to vector<128x128xf32>
    %5 = arith.addf %2, %4 : vector<128x128xf32>
    %cst_5 = arith.constant 0.000000e+00 : f32
    %6 = vector.broadcast %cst_5 : f32 to vector<128x128xf32>
    %7 = arith.maximumf %5, %6 : vector<128x128xf32>
    %c0_6 = arith.constant 0 : index
    %c0_7 = arith.constant 0 : index
    %8 = vector.load %arg4[%c0_6, %c0_7] : memref<128x128xbf16, #tpu.memory_space<vmem>>, vector<128x128xbf16>
    %9 = arith.truncf %7 : vector<128x128xf32> to vector<128x128xbf16>
    %cst_8 = arith.constant dense<0.000000e+00> : vector<128x128xf32>
    %10 = tpu.matmul %8, %9, %cst_8 {dimension_numbers = #tpu.dot_dimension_numbers<[1], [0], [0], [1], [0, 0, 1, 1], [], []>} : vector<128x128xbf16>, vector<128x128xbf16>, vector<128x128xf32> -> vector<128x128xf32>
    %c0_9 = arith.constant 0 : index
    %c0_10 = arith.constant 0 : index
    %11 = vector.load %arg5[%c0_9, %c0_10] : memref<128x1xf32, #tpu.memory_space<vmem>>, vector<128x1xf32>
    %12 = vector.broadcast %11 : vector<128x1xf32> to vector<128x128xf32>
    %13 = arith.addf %10, %12 : vector<128x128xf32>
    %cst_11 = arith.constant 0.000000e+00 : f32
    %14 = vector.broadcast %cst_11 : f32 to vector<128x128xf32>
    %15 = arith.maximumf %13, %14 : vector<128x128xf32>
    %c0_12 = arith.constant 0 : index
    %c0_13 = arith.constant 0 : index
    %16 = vector.load %arg6[%c0_12, %c0_13] : memref<8x128xbf16, #tpu.memory_space<vmem>>, vector<8x128xbf16>
    %17 = arith.truncf %15 : vector<128x128xf32> to vector<128x128xbf16>
    %cst_14 = arith.constant dense<0.000000e+00> : vector<8x128xf32>
    %18 = tpu.matmul %16, %17, %cst_14 {dimension_numbers = #tpu.dot_dimension_numbers<[1], [0], [0], [1], [0, 0, 1, 1], [], []>} : vector<8x128xbf16>, vector<128x128xbf16>, vector<8x128xf32> -> vector<8x128xf32>
    %c0_15 = arith.constant 0 : index
    %c0_16 = arith.constant 0 : index
    %19 = vector.load %arg7[%c0_15, %c0_16] : memref<8x1xf32, #tpu.memory_space<vmem>>, vector<8x1xf32>
    %20 = vector.broadcast %19 : vector<8x1xf32> to vector<8x128xf32>
    %21 = arith.addf %18, %20 : vector<8x128xf32>
    %c0_17 = arith.constant 0 : index
    %c0_18 = arith.constant 0 : index
    %22 = vector.load %arg8[%c0_17, %c0_18] : memref<8x128xf32, #tpu.memory_space<vmem>>, vector<8x128xf32>
    tpu.vector_store %arg8[%c0_17, %c0_18], %21 {strides = array<i32>} : memref<8x128xf32, #tpu.memory_space<vmem>>, vector<8x128xf32>,
    return
  }
  func.func @transform_0(%arg0: i32) -> (i32, i32) {
    %c0_i32 = arith.constant 0 : i32
    %c0_i32_0 = arith.constant 0 : i32
    return %c0_i32, %arg0 : i32, i32
  }
  func.func @transform_1(%arg0: i32) -> (i32, i32) {
    %c0_i32 = arith.constant 0 : i32
    %c0_i32_0 = arith.constant 0 : i32
    %c0_i32_1 = arith.constant 0 : i32
    return %c0_i32, %c0_i32_0 : i32, i32
  }
  func.func @transform_2(%arg0: i32) -> (i32, i32) {
    %c0_i32 = arith.constant 0 : i32
    %c0_i32_0 = arith.constant 0 : i32
    %c0_i32_1 = arith.constant 0 : i32
    return %c0_i32, %c0_i32_0 : i32, i32
  }
  func.func @transform_3(%arg0: i32) -> (i32, i32) {
    %c0_i32 = arith.constant 0 : i32
    %c0_i32_0 = arith.constant 0 : i32
    %c0_i32_1 = arith.constant 0 : i32
    return %c0_i32, %c0_i32_0 : i32, i32
  }
  func.func @transform_4(%arg0: i32) -> (i32, i32) {
    %c0_i32 = arith.constant 0 : i32
    %c0_i32_0 = arith.constant 0 : i32
    %c0_i32_1 = arith.constant 0 : i32
    return %c0_i32, %c0_i32_0 : i32, i32
  }
  func.func @transform_5(%arg0: i32) -> (i32, i32) {
    %c0_i32 = arith.constant 0 : i32
    %c0_i32_0 = arith.constant 0 : i32
    %c0_i32_1 = arith.constant 0 : i32
    return %c0_i32, %c0_i32_0 : i32, i32
  }
  func.func @transform_6(%arg0: i32) -> (i32, i32) {
    %c0_i32 = arith.constant 0 : i32
    %c0_i32_0 = arith.constant 0 : i32
    %c0_i32_1 = arith.constant 0 : i32
    return %c0_i32, %c0_i32_0 : i32, i32
  }
  func.func @transform_7(%arg0: i32) -> (i32, i32) {
    %c0_i32 = arith.constant 0 : i32
    %c0_i32_0 = arith.constant 0 : i32
    return %c0_i32, %arg0 : i32, i32
  }
}

</mosaic_0001>

<bundles_post_ra>
// kernel: tpu_custom_call.1
= control target key start
LH: loop header
LB: loop body
LE: loop exit
PB: predicated region body
PF: predicated region fallthrough
CT: control target
= control target key end

     0   :  { %vm140_vm0 = vcmask 64512   ;;  %v644_v3 = vmov 0   ;;  %s888_s0 = inlined_call_operand.vmem [shape: f32[8,128], index: 0, kind: input, shape index: {}]   ;;  %s889_s1 = inlined_call_operand.vmem [shape: f32[128,8], index: 1, kind: input, shape index: {}]   ;;  %s890_s2 = inlined_call_operand.vmem [shape: f32[128,1], index: 2, kind: input, shape index: {}]   ;;  %s891_s3 = inlined_call_operand.vmem [shape: bf16[128,128], index: 3, kind: input, shape index: {}]   ;;  %s892_s4 = inlined_call_operand.vmem [shape: f32[128,1], index: 4, kind: input, shape index: {}]   ;;  %s893_s5 = inlined_call_operand.vmem [shape: bf16[8,128], index: 5, kind: input, shape index: {}]   ;;  %s894_s6 = inlined_call_operand.vmem [shape: f32[8,1], index: 6, kind: input, shape index: {}]   ;;  %s895_s7 = inlined_call_operand.hbm [shape: f32[8,128], index: 7, kind: output, shape index: {}]  }
   0x1   :  { %v43_v0 = vld [vmem:[%s888_s0] sm:$0xff]  ;;  %v58_v1 = vld [vmem:[%s890_s2 + $0x70] sm:$0xff]  ;;  %616 = vset.pattern.permute.xlu1 %v644_v3  ;;  %615 = vset.pattern.permute.xlu0 %v644_v3  ;;  %v38_v6 = vld [vmem:[%s889_s1 + $0x58] sm:$0xff] }
   0x2   :  { %v56_v2 = vld [vmem:[%s890_s2 + $0x60] sm:$0xff]  ;;  %204 = vmatpush.msra.mxu0 %v43_v0  ;;  %132 = vperm.xlu0 %615, %v58_v1   ;;  %v54_v5 = vld [vmem:[%s890_s2 + $0x50] sm:$0xff]  ;;  %v59_v7 = vld [vmem:[%s890_s2 + $0x78] sm:$0xff] }
   0x3   :  { %v27_v4 = vld [vmem:[%s889_s1] sm:$0xff]  ;;  %122 = vperm.xlu1 %616, %v56_v2   ;;  %617 = vset.pattern.permute.xlu2 %v644_v3  ;;  %v57_v8 = vld [vmem:[%s890_s2 + $0x68] sm:$0xff] }
   0x4   :  { %548 = vmatmul.msk.f32.vlgmr.msra.gmra.mxu0 %vm140_vm0, %v27_v4  ;;  %604 = vmatpush.msra.mxu2 %v43_v0  ;;  %v28_v9 = vld [vmem:[%s889_s1 + $0x8] sm:$0xff] }
   0x5   :  { %112 = vperm.xlu2 %617, %v54_v5   ;;  %559 = vmatmul.msk.f32.vlgmr.msra.gmra.mxu2 %vm140_vm0, %v38_v6 }
   0x6   :  { %12 = vsyncpa [#allocation3], 0  ;;  %v55_v10 = vld [vmem:[%s890_s2 + $0x58] sm:$0xff]  ;;  %v39_v11 = vld [vmem:[%s889_s1 + $0x60] sm:$0xff]  ;;  %s645_s15 = smov [#allocation2]   ;;  %s539_s19 = sshll.u32 %s895_s7, 4  ;;  %s540_s19 = int_to_ptr.hbm [resolvable:$true] %s539_s19 }
   0x7   :  { %v52_v12 = vld [vmem:[%s890_s2 + $0x40] sm:$0xff]  ;;  %v53_v13 = vld [vmem:[%s890_s2 + $0x48] sm:$0xff]  ;;  %v29_v14 = vld [vmem:[%s889_s1 + $0x10] sm:$0xff]  ;;  %s537_s16 = sshll.u32 %s645_s15, 4  ;;  %s538_s16 = int_to_ptr.vmem [resolvable:$true] %s537_s16 }
   0x8   :  { %v50_v15 = vld [vmem:[%s890_s2 + $0x30] sm:$0xff]  ;;  %v40_v16 = vld [vmem:[%s889_s1 + $0x68] sm:$0xff]  ;;  %v51_v17 = vld [vmem:[%s890_s2 + $0x38] sm:$0xff] }
   0x9   :  { %v48_v18 = vld [vmem:[%s890_s2 + $0x20] sm:$0xff]  ;;  %v30_v19 = vld [vmem:[%s889_s1 + $0x18] sm:$0xff]  ;;  %v49_v20 = vld [vmem:[%s890_s2 + $0x28] sm:$0xff] }
   0xa   :  { %137 = vperm.xlu0 %615, %v59_v7   ;;  %v41_v21 = vld [vmem:[%s889_s1 + $0x70] sm:$0xff]  ;;  %v47_v23 = vld [vmem:[%s890_s2 + $0x18] sm:$0xff]  ;;  %v31_v24 = vld [vmem:[%s889_s1 + $0x20] sm:$0xff] }
   0xb   :  { %127 = vperm.xlu1 %616, %v57_v8   ;;  %v46_v22 = vld [vmem:[%s890_s2 + $0x10] sm:$0xff]  ;;  %v44_v25 = vld [vmem:[%s890_s2] sm:$0xff]  ;;  %v42_v26 = vld [vmem:[%s889_s1 + $0x78] sm:$0xff] }
   0xc   :  { %549 = vmatmul.msk.f32.gmra.mxu0 %vm140_vm0, %v28_v9  ;;  %v45_v27 = vld [vmem:[%s890_s2 + $0x8] sm:$0xff]  ;;  %v308_v28 = vld [vmem:[%s892_s4 + $0x70] sm:$0xff]  ;;  %v309_v30 = vld [vmem:[%s892_s4 + $0x78] sm:$0xff] }
   0xd   :  { %117 = vperm.xlu2 %617, %v55_v10   ;;  %560 = vmatmul.msk.f32.gmra.mxu2 %vm140_vm0, %v39_v11  ;;  %v32_v29 = vld [vmem:[%s889_s1 + $0x28] sm:$0xff]  ;;  %v306_v31 = vld [vmem:[%s892_s4 + $0x60] sm:$0xff]  ;;  %v33_v33 = vld [vmem:[%s889_s1 + $0x30] sm:$0xff] }
   0xe   :  { %v307_v32 = vld [vmem:[%s892_s4 + $0x68] sm:$0xff]  ;;  %v304_v34 = vld [vmem:[%s892_s4 + $0x50] sm:$0xff]  ;;  %v305_v35 = vld [vmem:[%s892_s4 + $0x58] sm:$0xff] }
   0xf   :  { %v302_v36 = vld [vmem:[%s892_s4 + $0x40] sm:$0xff]  ;;  %v34_v37 = vld [vmem:[%s889_s1 + $0x38] sm:$0xff]  ;;  %v303_v38 = vld [vmem:[%s892_s4 + $0x48] sm:$0xff] }
  0x10   :  { %v300_v39 = vld [vmem:[%s892_s4 + $0x30] sm:$0xff]  ;;  %v301_v40 = vld [vmem:[%s892_s4 + $0x38] sm:$0xff]  ;;  %v35_v41 = vld [vmem:[%s889_s1 + $0x40] sm:$0xff] }
  0x11   :  { %v298_v42 = vld [vmem:[%s892_s4 + $0x20] sm:$0xff]  ;;  %v299_v43 = vld [vmem:[%s892_s4 + $0x28] sm:$0xff]  ;;  %v296_v44 = vld [vmem:[%s892_s4 + $0x10] sm:$0xff] }
  0x12   :  { %102 = vperm.xlu0 %615, %v52_v12   ;;  %v36_v45 = vld [vmem:[%s889_s1 + $0x48] sm:$0xff]  ;;  %v297_v46 = vld [vmem:[%s892_s4 + $0x18] sm:$0xff]  ;;  %v294_v47 = vld [vmem:[%s892_s4] sm:$0xff] }
  0x13   :  { %107 = vperm.xlu1 %616, %v53_v13   ;;  %v295_v48 = vld [vmem:[%s892_s4 + $0x8] sm:$0xff]  ;;  %v37_v49 = vld [vmem:[%s889_s1 + $0x50] sm:$0xff]  ;;  %v512_v50 = vld [vmem:[%s894_s6] sm:$0xff] }
  0x14   :  { %550 = vmatmul.msk.f32.gmra.mxu0 %vm140_vm0, %v29_v14 }
  0x15   :  { %92 = vperm.xlu2 %617, %v50_v15   ;;  %561 = vmatmul.msk.f32.gmra.mxu2 %vm140_vm0, %v40_v16 }
  0x1a   :  { %97 = vperm.xlu0 %615, %v51_v17  }
  0x1b   :  { %82 = vperm.xlu1 %616, %v48_v18  }
  0x1c   :  { %551 = vmatmul.msk.f32.gmra.mxu0 %vm140_vm0, %v30_v19 }
  0x1d   :  { %87 = vperm.xlu2 %617, %v49_v20   ;;  %562 = vmatmul.msk.f32.gmra.mxu2 %vm140_vm0, %v41_v21 }
  0x22   :  { %72 = vperm.xlu0 %615, %v46_v22  }
  0x23   :  { %77 = vperm.xlu1 %616, %v47_v23  }
  0x24   :  { %552 = vmatmul.msk.f32.gmra.mxu0 %vm140_vm0, %v31_v24 }
  0x25   :  { %62 = vperm.xlu2 %617, %v44_v25   ;;  %563 = vmatmul.msk.f32.gmra.mxu2 %vm140_vm0, %v42_v26 }
  0x2a   :  { %67 = vperm.xlu0 %615, %v45_v27  }
  0x2b   :  { %382 = vperm.xlu1 %616, %v308_v28  }
  0x2c   :  { %553 = vmatmul.msk.f32.gmra.mxu0 %vm140_vm0, %v32_v29 }
  0x2d   :  { %387 = vperm.xlu2 %617, %v309_v30  }
  0x32   :  { %372 = vperm.xlu0 %615, %v306_v31  }
  0x33   :  { %377 = vperm.xlu1 %616, %v307_v32  }
  0x34   :  { %554 = vmatmul.msk.f32.gmra.mxu0 %vm140_vm0, %v33_v33 }
  0x35   :  { %362 = vperm.xlu2 %617, %v304_v34  }
  0x3a   :  { %367 = vperm.xlu0 %615, %v305_v35  }
  0x3b   :  { %352 = vperm.xlu1 %616, %v302_v36  }
  0x3c   :  { %555 = vmatmul.msk.f32.gmra.mxu0 %vm140_vm0, %v34_v37 }
  0x3d   :  { %357 = vperm.xlu2 %617, %v303_v38  }
  0x42   :  { %342 = vperm.xlu0 %615, %v300_v39  }
  0x43   :  { %347 = vperm.xlu1 %616, %v301_v40  }
  0x44   :  { %556 = vmatmul.msk.f32.gmra.mxu0 %vm140_vm0, %v35_v41 }
  0x45   :  { %332 = vperm.xlu2 %617, %v298_v42  }
  0x4a   :  { %337 = vperm.xlu0 %615, %v299_v43  }
  0x4b   :  { %322 = vperm.xlu1 %616, %v296_v44  }
  0x4c   :  { %557 = vmatmul.msk.f32.gmra.mxu0 %vm140_vm0, %v36_v45 }
  0x4d   :  { %327 = vperm.xlu2 %617, %v297_v46  }
  0x52   :  { %312 = vperm.xlu0 %615, %v294_v47  }
  0x53   :  { %317 = vperm.xlu1 %616, %v295_v48  }
  0x54   :  { %558 = vmatmul.msk.f32.gmra.mxu0 %vm140_vm0, %v37_v49 }
  0x55   :  { %515 = vperm.xlu2 %617, %v512_v50  }
  0x5f   :  { %v113_v51 = vpop.permute.xlu2 %112 }
  0x67   :  { %v118_v54 = vpop.permute.xlu2 %117 }
  0x6f   :  { %v93_v58 = vpop.permute.xlu2 %92 }
  0x74   :  { %v133_v52 = vpop.permute.xlu0 %132 }
  0x75   :  { %v123_v53 = vpop.permute.xlu1 %122 }
  0x77   :  { %v88_v0 = vpop.permute.xlu2 %87 }
  0x7c   :  { %v138_v55 = vpop.permute.xlu0 %137 }
  0x7d   :  { %v128_v56 = vpop.permute.xlu1 %127 }
  0x7f   :  { %v63_v5 = vpop.permute.xlu2 %62 }
  0x81   :  { %v206_v57 = vpop.f32.mrf.mxu0 }
  0x82   :  { %v207_v11 = vadd.f32 %v206_v57, %v63_v5 }
  0x84   :  { %v103_v59 = vpop.permute.xlu0 %102  ;;  %v254_v17 = vmax.f32 %v207_v11, 0.0 }
  0x85   :  { %v108_v60 = vpop.permute.xlu1 %107 }
  0x88   :  { %v239_v62 = vpop.f32.mrf.mxu2 }
  0x89   :  { %v209_v61 = vpop.f32.mrf.mxu0  ;;  %v240_v38 = vadd.f32 %v239_v62, %v118_v54  ;;  %v601_v62 = vld [vmem:[%s891_s3 + $0x28] sm:$0xff] }
  0x8b   :  { %v265_v42 = vmax.f32 %v240_v38, 0.0 }
  0x8c   :  { %v98_v63 = vpop.permute.xlu0 %97 }
  0x8d   :  { %v83_v1 = vpop.permute.xlu1 %82 }
  0x90   :  { %v242_v3 = vpop.f32.mrf.mxu2 }
  0x91   :  { %v212_v2 = vpop.f32.mrf.mxu0  ;;  %v243_v23 = vadd.f32 %v242_v3, %v123_v53 }
  0x93   :  { %v266_v29 = vmax.f32 %v243_v23, 0.0 }
  0x94   :  { %v73_v4 = vpop.permute.xlu0 %72 }
  0x95   :  { %v78_v6 = vpop.permute.xlu1 %77  ;;  %v213_v7 = vadd.f32 %v212_v2, %v73_v4  ;;  %v603_v2 = vld [vmem:[%s891_s3 + $0x38] sm:$0xff] }
  0x97   :  { %v256_v12 = vmax.f32 %v213_v7, 0.0 }
  0x98   :  { %v245_v9 = vpop.f32.mrf.mxu2 }
  0x99   :  { %v215_v8 = vpop.f32.mrf.mxu0  ;;  %v246_v24 = vadd.f32 %v245_v9, %v128_v56 }
  0x9a   :  { %v216_v10 = vadd.f32 %v215_v8, %v78_v6 }
  0x9b   :  { %v267_v30 = vmax.f32 %v246_v24, 0.0 }
  0x9c   :  { %v257_v13 = vmax.f32 %v216_v10, 0.0  ;;  %v68_v14 = vpop.permute.xlu0 %67 }
  0x9d   :  { %v210_v15 = vadd.f32 %v209_v61, %v68_v14  ;;  %v292_v33 = vpack.c.bf16 %v267_v30, %v266_v29  ;;  %v597_v61 = vld [vmem:[%s891_s3 + $0x8] sm:$0xff]  ;;  %v383_v11 = vpop.permute.xlu1 %382 }
  0x9e   :  { %v287_v16 = vpack.c.bf16 %v257_v13, %v256_v12  ;;  %v388_v13 = vpop.permute.xlu2 %387 }
  0x9f   :  { %v255_v18 = vmax.f32 %v210_v15, 0.0 }
  0xa0   :  { %v248_v20 = vpop.f32.mrf.mxu2 }
  0xa1   :  { %v218_v19 = vpop.f32.mrf.mxu0  ;;  %v286_v21 = vpack.c.bf16 %v255_v18, %v254_v17  ;;  %v249_v22 = vadd.f32 %v248_v20, %v133_v52 }
  0xa3   :  { %v268_v27 = vmax.f32 %v249_v22, 0.0 }
  0xa4   :  { %v373_v17 = vpop.permute.xlu0 %372 }
  0xa5   :  { %v378_v15 = vpop.permute.xlu1 %377 }
  0xa6   :  { %v363_v18 = vpop.permute.xlu2 %362 }
  0xa8   :  { %v251_v26 = vpop.f32.mrf.mxu2 }
  0xa9   :  { %v221_v25 = vpop.f32.mrf.mxu0  ;;  %v252_v28 = vadd.f32 %v251_v26, %v138_v55  ;;  %v219_v55 = vadd.f32 %v218_v19, %v83_v1  ;;  %v599_v1 = vld [vmem:[%s891_s3 + $0x18] sm:$0xff] }
  0xaa   :  { %v222_v50 = vadd.f32 %v221_v25, %v88_v0  ;;  %v602_v0 = vld [vmem:[%s891_s3 + $0x30] sm:$0xff] }
  0xab   :  { %v269_v31 = vmax.f32 %v252_v28, 0.0 }
  0xac   :  { %v259_v54 = vmax.f32 %v222_v50, 0.0  ;;  %v368_v22 = vpop.permute.xlu0 %367 }
  0xad   :  { %v293_v32 = vpack.c.bf16 %v269_v31, %v268_v27 }
  0xae   :  { %v358_v23 = vpop.permute.xlu2 %357 }
  0xaf   :  { %438 = vmatpush.bf16.msra.mxu1 %v293_v32  ;;  %605 = vmatpush.bf16.msra.mxu3 %v293_v32 }
  0xb1   :  { %v224_v34 = vpop.f32.mrf.mxu0 }
  0xb2   :  { %v225_v48 = vadd.f32 %v224_v34, %v93_v58  ;;  %v596_v58 = vld [vmem:[%s891_s3] sm:$0xff] }
  0xb3   :  { %439 = vmatpush.bf16.msra.mxu1 %v292_v33  ;;  %606 = vmatpush.bf16.msra.mxu3 %v292_v33 }
  0xb4   :  { %v260_v56 = vmax.f32 %v225_v48, 0.0 }
  0xb9   :  { %v227_v35 = vpop.f32.mrf.mxu0 }
  0xba   :  { %v228_v45 = vadd.f32 %v227_v35, %v98_v63  ;;  %v598_v63 = vld [vmem:[%s891_s3 + $0x10] sm:$0xff] }
  0xbc   :  { %v261_v52 = vmax.f32 %v228_v45, 0.0 }
  0xbe   :  { %v289_v57 = vpack.c.bf16 %v261_v52, %v260_v56 }
  0xc1   :  { %v230_v36 = vpop.f32.mrf.mxu0 }
  0xc2   :  { %v231_v43 = vadd.f32 %v230_v36, %v103_v59  ;;  %v343_v36 = vpop.permute.xlu0 %342 }
  0xc4   :  { %v262_v49 = vmax.f32 %v231_v43, 0.0 }
  0xc9   :  { %v233_v37 = vpop.f32.mrf.mxu0 }
  0xca   :  { %v234_v40 = vadd.f32 %v233_v37, %v108_v60  ;;  %v600_v60 = vld [vmem:[%s891_s3 + $0x20] sm:$0xff] }
  0xcc   :  { %v263_v46 = vmax.f32 %v234_v40, 0.0 }
  0xce   :  { %v290_v53 = vpack.c.bf16 %v263_v46, %v262_v49 }
  0xd1   :  { %v236_v39 = vpop.f32.mrf.mxu0 }
  0xd2   :  { %v237_v41 = vadd.f32 %v236_v39, %v113_v51  ;;  %v258_v51 = vmax.f32 %v219_v55, 0.0 }
  0xd4   :  { %v264_v44 = vmax.f32 %v237_v41, 0.0  ;;  %v288_v59 = vpack.c.bf16 %v259_v54, %v258_v51 }
  0xd6   :  { %v291_v47 = vpack.c.bf16 %v265_v42, %v264_v44  ;;  %v333_v42 = vpop.permute.xlu2 %332 }
  0xd8   :  { %440 = vmatpush.bf16.msra.mxu1 %v291_v47  ;;  %607 = vmatpush.bf16.msra.mxu3 %v291_v47 }
  0xdc   :  { %441 = vmatpush.bf16.msra.mxu1 %v290_v53  ;;  %608 = vmatpush.bf16.msra.mxu3 %v290_v53  ;;  %v338_v53 = vpop.permute.xlu0 %337 }
  0xe0   :  { %442 = vmatpush.bf16.msra.mxu1 %v289_v57  ;;  %609 = vmatpush.bf16.msra.mxu3 %v289_v57 }
  0xe4   :  { %443 = vmatpush.bf16.msra.mxu1 %v288_v59  ;;  %610 = vmatpush.bf16.msra.mxu3 %v288_v59  ;;  %v328_v59 = vpop.permute.xlu2 %327 }
  0xe8   :  { %444 = vmatpush.bf16.msra.mxu1 %v287_v16  ;;  %611 = vmatpush.bf16.msra.mxu3 %v287_v16 }
  0xec   :  { %445 = vmatpush.bf16.msra.mxu1 %v286_v21  ;;  %612 = vmatpush.bf16.msra.mxu3 %v286_v21  ;;  %v353_v21 = vpop.permute.xlu1 %352 }
  0xef   :  { %446 = vmatmul.bf16.vlgmr.msra.gmra.mxu1 %v596_v58  ;;  %466 = vmatmul.bf16.vlgmr.msra.gmra.mxu3 %v600_v60 }
  0xf4   :  { %v348_v32 = vpop.permute.xlu1 %347 }
  0xfc   :  { %v323_v49 = vpop.permute.xlu1 %322 }
  0xff   :  { %451 = vmatmul.bf16.gmra.mxu1 %v597_v61  ;;  %471 = vmatmul.bf16.gmra.mxu3 %v601_v62 }
 0x10f   :  { %456 = vmatmul.bf16.gmra.mxu1 %v598_v63  ;;  %476 = vmatmul.bf16.gmra.mxu3 %v602_v0  ;;  %v318_v0 = vpop.permute.xlu1 %317 }
 0x11f   :  { %461 = vmatmul.bf16.gmra.mxu1 %v599_v1  ;;  %481 = vmatmul.bf16.gmra.mxu3 %v603_v2 }
 0x16c   :  { %v876_v3 = vpop.f32.mrf.mxu1 }
 0x172   :  { %v467_v4 = vpop.f32.mrf.mxu3 }
 0x173   :  { %v468_v44 = vadd.f32 %v467_v4, %v353_v21 }
 0x174   :  { %v878_v5 = vpop.f32.mrf.mxu1 }
 0x175   :  { %v495_v50 = vmax.f32 %v468_v44, 0.0  ;;  %v450_v1 = vadd.f32 %v878_v5, %v318_v0 }
 0x17a   :  { %v469_v6 = vpop.f32.mrf.mxu3 }
 0x17b   :  { %v470_v39 = vadd.f32 %v469_v6, %v358_v23  ;;  %v313_v6 = vpop.permute.xlu0 %312 }
 0x17c   :  { %v452_v7 = vpop.f32.mrf.mxu1 }
 0x17d   :  { %v496_v46 = vmax.f32 %v470_v39, 0.0  ;;  %v453_v62 = vadd.f32 %v452_v7, %v323_v49  ;;  %v503_v7 = vld [vmem:[%s893_s5] sm:$0xf] }
 0x17f   :  { %v508_v54 = vpack.c.bf16 %v496_v46, %v495_v50 }
 0x182   :  { %v472_v8 = vpop.f32.mrf.mxu3 }
 0x183   :  { %v473_v37 = vadd.f32 %v472_v8, %v363_v18  ;;  %v448_v8 = vadd.f32 %v876_v3, %v313_v6  ;;  %v516_v3 = vpop.permute.xlu2 %515 }
 0x184   :  { %v454_v10 = vpop.f32.mrf.mxu1 }
 0x185   :  { %v497_v45 = vmax.f32 %v473_v37, 0.0  ;;  %v455_v58 = vadd.f32 %v454_v10, %v328_v59 }
 0x187   :  { %v490_v2 = vmax.f32 %v455_v58, 0.0 }
 0x18a   :  { %v474_v9 = vpop.f32.mrf.mxu3 }
 0x18b   :  { %v475_v33 = vadd.f32 %v474_v9, %v368_v22  ;;  %v489_v9 = vmax.f32 %v453_v62, 0.0 }
 0x18c   :  { %v457_v14 = vpop.f32.mrf.mxu1 }
 0x18d   :  { %v498_v40 = vmax.f32 %v475_v33, 0.0  ;;  %v458_v57 = vadd.f32 %v457_v14, %v333_v42 }
 0x18f   :  { %v509_v48 = vpack.c.bf16 %v498_v40, %v497_v45  ;;  %v491_v63 = vmax.f32 %v458_v57, 0.0 }
 0x192   :  { %v477_v12 = vpop.f32.mrf.mxu3 }
 0x193   :  { %v478_v29 = vadd.f32 %v477_v12, %v373_v17  ;;  %v505_v12 = vpack.c.bf16 %v490_v2, %v489_v9 }
 0x194   :  { %v459_v19 = vpop.f32.mrf.mxu1 }
 0x195   :  { %v499_v38 = vmax.f32 %v478_v29, 0.0  ;;  %v460_v55 = vadd.f32 %v459_v19, %v338_v53 }
 0x197   :  { %v492_v60 = vmax.f32 %v460_v55, 0.0 }
 0x199   :  { %v506_v4 = vpack.c.bf16 %v492_v60, %v491_v63 }
 0x19a   :  { %v479_v16 = vpop.f32.mrf.mxu3 }
 0x19b   :  { %v480_v27 = vadd.f32 %v479_v16, %v378_v15 }
 0x19c   :  { %v462_v25 = vpop.f32.mrf.mxu1 }
 0x19d   :  { %v500_v34 = vmax.f32 %v480_v27, 0.0  ;;  %v463_v52 = vadd.f32 %v462_v25, %v343_v36 }
 0x19f   :  { %v510_v41 = vpack.c.bf16 %v500_v34, %v499_v38  ;;  %v493_v51 = vmax.f32 %v463_v52, 0.0 }
 0x1a2   :  { %v482_v20 = vpop.f32.mrf.mxu3 }
 0x1a3   :  { %v483_v24 = vadd.f32 %v482_v20, %v383_v11  ;;  %v488_v11 = vmax.f32 %v450_v1, 0.0 }
 0x1a4   :  { %v464_v43 = vpop.f32.mrf.mxu1 }
 0x1a5   :  { %v501_v30 = vmax.f32 %v483_v24, 0.0  ;;  %v465_v47 = vadd.f32 %v464_v43, %v348_v32 }
 0x1a7   :  { %v494_v56 = vmax.f32 %v465_v47, 0.0 }
 0x1a9   :  { %v507_v61 = vpack.c.bf16 %v494_v56, %v493_v51 }
 0x1aa   :  { %v484_v26 = vpop.f32.mrf.mxu3 }
 0x1ab   :  { %v485_v28 = vadd.f32 %v484_v26, %v388_v13  ;;  %v487_v13 = vmax.f32 %v448_v8, 0.0 }
 0x1ad   :  { %v502_v31 = vmax.f32 %v485_v28, 0.0  ;;  %v504_v10 = vpack.c.bf16 %v488_v11, %v487_v13 }
 0x1af   :  { %v511_v35 = vpack.c.bf16 %v502_v31, %v501_v30 }
 0x1b1   :  { %518 = vmatpush.bf16.msrb.mxu2 %v511_v35 }
 0x1b5   :  { %519 = vmatpush.bf16.msrb.mxu2 %v510_v41 }
 0x1b9   :  { %520 = vmatpush.bf16.msrb.mxu2 %v509_v48 }
 0x1bd   :  { %521 = vmatpush.bf16.msrb.mxu2 %v508_v54 }
 0x1c1   :  { %522 = vmatpush.bf16.msrb.mxu2 %v507_v61 }
 0x1c5   :  { %523 = vmatpush.bf16.msrb.mxu2 %v506_v4 }
 0x1c9   :  { %524 = vmatpush.bf16.msrb.mxu2 %v505_v12 }
 0x1cd   :  { %525 = vmatpush.bf16.msrb.mxu2 %v504_v10 }
 0x1d0   :  { %526 = vmatmul.bf16.vlgmr.msrb.gmra.mxu2 %v503_v7 }
 0x253   :  { %v527_v5 = vpop.f32.mrf.mxu2 }
 0x254   :  { %v528_v14 = vadd.f32 %v527_v5, %v516_v3 }
 0x256   :  { %531 = vst [vmem:[#allocation2] sm:$0xff] %v528_v14 }
 0x257   :  { %542 = dma.vmem_to_hbm [thread:$0]  %s538_s16, 128, %s540_s19, [#allocation3]  }
 0x25b   :  { %v529_v15 = vpop.f32.mrf.mxu2 }
 0x25c   :  { %642 = dma.done.wait [#allocation3], 128  }
 0x25d   :  { %643 = vsyncadd [#allocation3], 4294967168 }
 0x25e   :  { %547 = vsyncpa [#allocation3], 1 }

</bundles_post_ra>
